<compile_context>
chip_gen: v5e
topology: v5e:2x2
jax: 0.10.0
libtpu: 0.0.40
codegen_flags: <defaults>
</compile_context>

<pallas_src>
import functools

import jax
import jax.numpy as jnp
from jax.experimental import pallas as pl
from jax.experimental.pallas import tpu as pltpu


def lstm_softmax_kernel(x_ref, wih_ref, whh_ref, b_ref, out_ref, *, S, BP, H):
    """x_ref: (S*BP, F) f32, wih_ref: (F, 4H) f32, whh_ref: (H, 4H) bf16,
    b_ref: (1, 4H) f32, out_ref: (BP, H) f32.  Entire recurrence runs in
    registers; only h @ W_hh^T + one sigmoid + one tanh stay per-step."""
    # Hoist weight / bias loads out of the loop (JAX does not CSE these in loops).
    wih = wih_ref[...]                                   # (F, 4H) f32
    whh = whh_ref[...]                                   # (H, 4H) bf16
    b = b_ref[...]                                       # (1, 4H) f32

    # g-lane scale vector for tanh(x) = 2*sigmoid(2x) - 1: double the g-gate
    # lanes [2H, 3H) once, above the loop, by folding the scale into xw and
    # into the g-columns of W_hh (exact: scale is 1.0 or 2.0).
    col = jax.lax.broadcasted_iota(jnp.int32, (1, 4 * H), 1)
    g_scale = jnp.where((col >= 2 * H) & (col < 3 * H),
                        jnp.float32(2.0), jnp.float32(1.0))          # (1, 4H)
    whh = whh * g_scale.astype(whh.dtype)                            # still bf16

    # One-shot input projection for all timesteps (off the serial critical
    # path, kept in f32): (S*BP, F) @ (F, 4H) + b, with g-lanes pre-doubled.
    xw = (jnp.dot(x_ref[...], wih, preferred_element_type=jnp.float32) + b) * g_scale

    h = jnp.zeros((BP, H), jnp.float32)
    c = jnp.zeros((BP, H), jnp.float32)

    # Unrolled recurrence (S is a small static constant).  Per step the serial
    # chain is: bf16 h @ W_hh^T (MXU) -> sigmoid (EUP) -> cheap VPU gate math
    # -> tanh(c) (EUP).
    for t in range(S):
        gates = xw[t * BP:(t + 1) * BP, :] + jnp.dot(
            h.astype(whh.dtype), whh, preferred_element_type=jnp.float32
        )                                                # (BP, 4H) f32

        # Single full-vreg EUP pass; g-lanes already carry 2x their raw value.
        sig = jax.nn.sigmoid(gates)

        # PyTorch gate order: i, f, g, o  (32-lane slices; XLU is idle here).
        i_g = sig[:, 0 * H:1 * H]
        f_g = sig[:, 1 * H:2 * H]
        g_g = 2.0 * sig[:, 2 * H:3 * H] - 1.0            # tanh via scaled sigmoid
        o_g = sig[:, 3 * H:4 * H]

        c = f_g * c + i_g * g_g
        h = o_g * jnp.tanh(c)

    # Max-stabilized softmax over the hidden dim of the final hidden state.
    # Division replaced by approximate reciprocal on the (otherwise idle) EUP.
    m = jnp.max(h, axis=-1, keepdims=True)
    e = jnp.exp(h - m)
    out_ref[...] = e * pl.reciprocal(jnp.sum(e, axis=-1, keepdims=True), approx=True)


def lstm_softmax(x, w_ih, w_hh, b_ih, b_hh):
    """x: (S, B, F) f32. Weights in PyTorch layout:
       w_ih: (4H, F), w_hh: (4H, H), b_ih/b_hh: (4H,). Returns (B, H) softmax(h_T)."""
    S, B, F = x.shape
    H = w_hh.shape[1]

    # Pad batch up to a full sublane so per-step xw slices are vreg-aligned
    # and the per-step MXU LHS is a clean (8, H) tile.  Pad rows cost nothing
    # (they live in lanes/sublanes that would be masked anyway).
    BP = ((B + 7) // 8) * 8
    x_pad = jnp.zeros((S, BP, F), jnp.float32).at[:, :B, :].set(
        jnp.asarray(x, jnp.float32))
    x2 = x_pad.reshape(S * BP, F)

    wih_t = jnp.asarray(w_ih, jnp.float32).T                          # (F, 4H) f32
    whh_t = jnp.asarray(w_hh, jnp.float32).T.astype(jnp.bfloat16)     # (H, 4H) bf16
    b = (jnp.asarray(b_ih, jnp.float32)
         + jnp.asarray(b_hh, jnp.float32)).reshape(1, 4 * H)

    kernel = functools.partial(lstm_softmax_kernel, S=S, BP=BP, H=H)

    grid_spec = pltpu.PrefetchScalarGridSpec(
        num_scalar_prefetch=0,
        grid=(1,),
        in_specs=[
            pl.BlockSpec((S * BP, F), lambda i: (0, 0)),
            pl.BlockSpec((F, 4 * H), lambda i: (0, 0)),
            pl.BlockSpec((H, 4 * H), lambda i: (0, 0)),
            pl.BlockSpec((1, 4 * H), lambda i: (0, 0)),
        ],
        out_specs=pl.BlockSpec((BP, H), lambda i: (0, 0)),
    )

    out_padded = pl.pallas_call(
        kernel,
        out_shape=jax.ShapeDtypeStruct((BP, H), jnp.float32),
        grid_spec=grid_spec,
        compiler_params=pltpu.CompilerParams(
            dimension_semantics=("arbitrary",),
        ),
    )(x2, wih_t, whh_t, b)

    return out_padded[:B]


def _reference(x, w_ih, w_hh, b_ih, b_hh):
    """Pure-JAX f32 reference of the same forward pass (for a sanity check)."""
    S, B, F = x.shape
    H = w_hh.shape[1]
    h = jnp.zeros((B, H), jnp.float32)
    c = jnp.zeros((B, H), jnp.float32)
    for t in range(S):
        gates = x[t] @ w_ih.T + h @ w_hh.T + b_ih + b_hh
        i = jax.nn.sigmoid(gates[:, 0 * H:1 * H])
        f = jax.nn.sigmoid(gates[:, 1 * H:2 * H])
        g = jnp.tanh(gates[:, 2 * H:3 * H])
        o = jax.nn.sigmoid(gates[:, 3 * H:4 * H])
        c = f * c + i * g
        h = o * jnp.tanh(c)
    return jax.nn.softmax(h, axis=-1)


if __name__ == "__main__":
    # Small shapes consistent with the module's forward.
    SEQ, BATCH, N_FEATURES, HIDDEN = 8, 2, 4, 32

    key = jax.random.PRNGKey(0)
    k_x, k_wih, k_whh, k_bih, k_bhh = jax.random.split(key, 5)

    # Deterministic parameter init, matching PyTorch LSTM default U(-1/sqrt(H), 1/sqrt(H)).
    bound = 1.0 / (HIDDEN ** 0.5)
    w_ih = jax.random.uniform(k_wih, (4 * HIDDEN, N_FEATURES), jnp.float32, -bound, bound)
    w_hh = jax.random.uniform(k_whh, (4 * HIDDEN, HIDDEN), jnp.float32, -bound, bound)
    b_ih = jax.random.uniform(k_bih, (4 * HIDDEN,), jnp.float32, -bound, bound)
    b_hh = jax.random.uniform(k_bhh, (4 * HIDDEN,), jnp.float32, -bound, bound)

    x = jax.random.normal(k_x, (SEQ, BATCH, N_FEATURES), jnp.float32)

    out = lstm_softmax(x, w_ih, w_hh, b_ih, b_hh)
    out = jax.block_until_ready(out)

    ref = _reference(x, w_ih, w_hh, b_ih, b_hh)
    assert out.shape == (BATCH, HIDDEN)
    assert jnp.allclose(out, ref, rtol=1e-3, atol=1e-3), "mismatch vs pure-JAX reference"

    print("KERNEL_OK")
</pallas_src>

<mosaic_0001>
module attributes {stable_mosaic.version = 11 : i64} {
  func.func @lstm_softmax_kernel(%arg0: i32, %arg1: memref<64x4xf32, #tpu.memory_space<vmem>>, %arg2: memref<4x128xf32, #tpu.memory_space<vmem>>, %arg3: memref<32x128xbf16, #tpu.memory_space<vmem>>, %arg4: memref<1x128xf32, #tpu.memory_space<vmem>>, %arg5: memref<8x32xf32, #tpu.memory_space<vmem>>) attributes {dimension_semantics = [#tpu.dimension_semantics<arbitrary>], iteration_bounds = array<i64: 1>, scalar_prefetch = 0 : i64, scratch_operands = 0 : i64, tpu.core_type = #tpu.core_type<tc>, window_params = [{pipeline_mode = #tpu.pipeline_mode<synchronous>, transform_indices = @transform_0, window_bounds = array<i64: 64, 4>}, {pipeline_mode = #tpu.pipeline_mode<synchronous>, transform_indices = @transform_1, window_bounds = array<i64: 4, 128>}, {pipeline_mode = #tpu.pipeline_mode<synchronous>, transform_indices = @transform_2, window_bounds = array<i64: 32, 128>}, {pipeline_mode = #tpu.pipeline_mode<synchronous>, transform_indices = @transform_3, window_bounds = array<i64: 1, 128>}, {pipeline_mode = #tpu.pipeline_mode<synchronous>, transform_indices = @transform_4, window_bounds = array<i64: 8, 32>}]} {
    %c0 = arith.constant 0 : index
    %c0_0 = arith.constant 0 : index
    %0 = vector.load %arg2[%c0, %c0_0] : memref<4x128xf32, #tpu.memory_space<vmem>>, vector<4x128xf32>
    %c0_1 = arith.constant 0 : index
    %c0_2 = arith.constant 0 : index
    %1 = vector.load %arg3[%c0_1, %c0_2] : memref<32x128xbf16, #tpu.memory_space<vmem>>, vector<32x128xbf16>
    %c0_3 = arith.constant 0 : index
    %c0_4 = arith.constant 0 : index
    %2 = vector.load %arg4[%c0_3, %c0_4] : memref<1x128xf32, #tpu.memory_space<vmem>>, vector<1x128xf32>
    %3 = tpu.iota {dimensions = array<i32: 1>} : vector<1x128xi32>
    %c64_i32 = arith.constant 64 : i32
    %4 = vector.broadcast %c64_i32 : i32 to vector<1x128xi32>
    %5 = arith.cmpi sge, %3, %4 : vector<1x128xi32>
    %c96_i32 = arith.constant 96 : i32
    %6 = vector.broadcast %c96_i32 : i32 to vector<1x128xi32>
    %7 = arith.cmpi slt, %3, %6 : vector<1x128xi32>
    %8 = arith.andi %5, %7 : vector<1x128xi1>
    %cst = arith.constant 2.000000e+00 : f32
    %cst_5 = arith.constant 1.000000e+00 : f32
    %9 = vector.broadcast %cst : f32 to vector<1x128xf32>
    %10 = vector.broadcast %cst_5 : f32 to vector<1x128xf32>
    %11 = arith.select %8, %9, %10 : vector<1x128xi1>, vector<1x128xf32>
    %12 = arith.truncf %11 : vector<1x128xf32> to vector<1x128xbf16>
    %13 = vector.broadcast %12 : vector<1x128xbf16> to vector<32x128xbf16>
    %14 = arith.mulf %1, %13 : vector<32x128xbf16>
    %c0_6 = arith.constant 0 : index
    %c0_7 = arith.constant 0 : index
    %15 = vector.load %arg1[%c0_6, %c0_7] : memref<64x4xf32, #tpu.memory_space<vmem>>, vector<64x4xf32>
    %cst_8 = arith.constant dense<0.000000e+00> : vector<64x128xf32>
    %16 = tpu.matmul %15, %0, %cst_8 {dimension_numbers = #tpu.dot_dimension_numbers<[1], [0], [0], [1], [0, 0, 1, 1], [], []>} : vector<64x4xf32>, vector<4x128xf32>, vector<64x128xf32> -> vector<64x128xf32>
    %17 = vector.broadcast %2 : vector<1x128xf32> to vector<64x128xf32>
    %18 = arith.addf %16, %17 : vector<64x128xf32>
    %19 = vector.broadcast %11 : vector<1x128xf32> to vector<64x128xf32>
    %20 = arith.mulf %18, %19 : vector<64x128xf32>
    %cst_9 = arith.constant 0.000000e+00 : f32
    %21 = vector.broadcast %cst_9 : f32 to vector<8x32xf32>
    %cst_10 = arith.constant 0.000000e+00 : f32
    %22 = vector.broadcast %cst_10 : f32 to vector<8x32xf32>
    %23 = vector.extract_strided_slice %20 {offsets = [0, 0], sizes = [8, 128], strides = [1, 1]} : vector<64x128xf32> to vector<8x128xf32>
    %24 = arith.truncf %21 : vector<8x32xf32> to vector<8x32xbf16>
    %cst_11 = arith.constant dense<0.000000e+00> : vector<8x128xf32>
    %25 = tpu.matmul %24, %14, %cst_11 {dimension_numbers = #tpu.dot_dimension_numbers<[1], [0], [0], [1], [0, 0, 1, 1], [], []>} : vector<8x32xbf16>, vector<32x128xbf16>, vector<8x128xf32> -> vector<8x128xf32>
    %26 = arith.addf %23, %25 : vector<8x128xf32>
    %27 = arith.negf %26 : vector<8x128xf32>
    %28 = math.exp %27 : vector<8x128xf32>
    %cst_12 = arith.constant 1.000000e+00 : f32
    %29 = vector.broadcast %cst_12 : f32 to vector<8x128xf32>
    %30 = arith.addf %29, %28 : vector<8x128xf32>
    %31 = arith.divf %29, %30 : vector<8x128xf32>
    %32 = vector.extract_strided_slice %31 {offsets = [0, 0], sizes = [8, 32], strides = [1, 1]} : vector<8x128xf32> to vector<8x32xf32>
    %33 = vector.extract_strided_slice %31 {offsets = [0, 32], sizes = [8, 32], strides = [1, 1]} : vector<8x128xf32> to vector<8x32xf32>
    %34 = vector.extract_strided_slice %31 {offsets = [0, 64], sizes = [8, 32], strides = [1, 1]} : vector<8x128xf32> to vector<8x32xf32>
    %cst_13 = arith.constant 2.000000e+00 : f32
    %35 = vector.broadcast %cst_13 : f32 to vector<8x32xf32>
    %36 = arith.mulf %35, %34 : vector<8x32xf32>
    %cst_14 = arith.constant 1.000000e+00 : f32
    %37 = vector.broadcast %cst_14 : f32 to vector<8x32xf32>
    %38 = arith.subf %36, %37 : vector<8x32xf32>
    %39 = vector.extract_strided_slice %31 {offsets = [0, 96], sizes = [8, 32], strides = [1, 1]} : vector<8x128xf32> to vector<8x32xf32>
    %40 = arith.mulf %33, %22 : vector<8x32xf32>
    %41 = arith.mulf %32, %38 : vector<8x32xf32>
    %42 = arith.addf %40, %41 : vector<8x32xf32>
    %43 = math.tanh %42 : vector<8x32xf32>
    %44 = arith.mulf %39, %43 : vector<8x32xf32>
    %45 = vector.extract_strided_slice %20 {offsets = [8, 0], sizes = [8, 128], strides = [1, 1]} : vector<64x128xf32> to vector<8x128xf32>
    %46 = arith.truncf %44 : vector<8x32xf32> to vector<8x32xbf16>
    %cst_15 = arith.constant dense<0.000000e+00> : vector<8x128xf32>
    %47 = tpu.matmul %46, %14, %cst_15 {dimension_numbers = #tpu.dot_dimension_numbers<[1], [0], [0], [1], [0, 0, 1, 1], [], []>} : vector<8x32xbf16>, vector<32x128xbf16>, vector<8x128xf32> -> vector<8x128xf32>
    %48 = arith.addf %45, %47 : vector<8x128xf32>
    %49 = arith.negf %48 : vector<8x128xf32>
    %50 = math.exp %49 : vector<8x128xf32>
    %cst_16 = arith.constant 1.000000e+00 : f32
    %51 = vector.broadcast %cst_16 : f32 to vector<8x128xf32>
    %52 = arith.addf %51, %50 : vector<8x128xf32>
    %53 = arith.divf %51, %52 : vector<8x128xf32>
    %54 = vector.extract_strided_slice %53 {offsets = [0, 0], sizes = [8, 32], strides = [1, 1]} : vector<8x128xf32> to vector<8x32xf32>
    %55 = vector.extract_strided_slice %53 {offsets = [0, 32], sizes = [8, 32], strides = [1, 1]} : vector<8x128xf32> to vector<8x32xf32>
    %56 = vector.extract_strided_slice %53 {offsets = [0, 64], sizes = [8, 32], strides = [1, 1]} : vector<8x128xf32> to vector<8x32xf32>
    %cst_17 = arith.constant 2.000000e+00 : f32
    %57 = vector.broadcast %cst_17 : f32 to vector<8x32xf32>
    %58 = arith.mulf %57, %56 : vector<8x32xf32>
    %cst_18 = arith.constant 1.000000e+00 : f32
    %59 = vector.broadcast %cst_18 : f32 to vector<8x32xf32>
    %60 = arith.subf %58, %59 : vector<8x32xf32>
    %61 = vector.extract_strided_slice %53 {offsets = [0, 96], sizes = [8, 32], strides = [1, 1]} : vector<8x128xf32> to vector<8x32xf32>
    %62 = arith.mulf %55, %42 : vector<8x32xf32>
    %63 = arith.mulf %54, %60 : vector<8x32xf32>
    %64 = arith.addf %62, %63 : vector<8x32xf32>
    %65 = math.tanh %64 : vector<8x32xf32>
    %66 = arith.mulf %61, %65 : vector<8x32xf32>
    %67 = vector.extract_strided_slice %20 {offsets = [16, 0], sizes = [8, 128], strides = [1, 1]} : vector<64x128xf32> to vector<8x128xf32>
    %68 = arith.truncf %66 : vector<8x32xf32> to vector<8x32xbf16>
    %cst_19 = arith.constant dense<0.000000e+00> : vector<8x128xf32>
    %69 = tpu.matmul %68, %14, %cst_19 {dimension_numbers = #tpu.dot_dimension_numbers<[1], [0], [0], [1], [0, 0, 1, 1], [], []>} : vector<8x32xbf16>, vector<32x128xbf16>, vector<8x128xf32> -> vector<8x128xf32>
    %70 = arith.addf %67, %69 : vector<8x128xf32>
    %71 = arith.negf %70 : vector<8x128xf32>
    %72 = math.exp %71 : vector<8x128xf32>
    %cst_20 = arith.constant 1.000000e+00 : f32
    %73 = vector.broadcast %cst_20 : f32 to vector<8x128xf32>
    %74 = arith.addf %73, %72 : vector<8x128xf32>
    %75 = arith.divf %73, %74 : vector<8x128xf32>
    %76 = vector.extract_strided_slice %75 {offsets = [0, 0], sizes = [8, 32], strides = [1, 1]} : vector<8x128xf32> to vector<8x32xf32>
    %77 = vector.extract_strided_slice %75 {offsets = [0, 32], sizes = [8, 32], strides = [1, 1]} : vector<8x128xf32> to vector<8x32xf32>
    %78 = vector.extract_strided_slice %75 {offsets = [0, 64], sizes = [8, 32], strides = [1, 1]} : vector<8x128xf32> to vector<8x32xf32>
    %cst_21 = arith.constant 2.000000e+00 : f32
    %79 = vector.broadcast %cst_21 : f32 to vector<8x32xf32>
    %80 = arith.mulf %79, %78 : vector<8x32xf32>
    %cst_22 = arith.constant 1.000000e+00 : f32
    %81 = vector.broadcast %cst_22 : f32 to vector<8x32xf32>
    %82 = arith.subf %80, %81 : vector<8x32xf32>
    %83 = vector.extract_strided_slice %75 {offsets = [0, 96], sizes = [8, 32], strides = [1, 1]} : vector<8x128xf32> to vector<8x32xf32>
    %84 = arith.mulf %77, %64 : vector<8x32xf32>
    %85 = arith.mulf %76, %82 : vector<8x32xf32>
    %86 = arith.addf %84, %85 : vector<8x32xf32>
    %87 = math.tanh %86 : vector<8x32xf32>
    %88 = arith.mulf %83, %87 : vector<8x32xf32>
    %89 = vector.extract_strided_slice %20 {offsets = [24, 0], sizes = [8, 128], strides = [1, 1]} : vector<64x128xf32> to vector<8x128xf32>
    %90 = arith.truncf %88 : vector<8x32xf32> to vector<8x32xbf16>
    %cst_23 = arith.constant dense<0.000000e+00> : vector<8x128xf32>
    %91 = tpu.matmul %90, %14, %cst_23 {dimension_numbers = #tpu.dot_dimension_numbers<[1], [0], [0], [1], [0, 0, 1, 1], [], []>} : vector<8x32xbf16>, vector<32x128xbf16>, vector<8x128xf32> -> vector<8x128xf32>
    %92 = arith.addf %89, %91 : vector<8x128xf32>
    %93 = arith.negf %92 : vector<8x128xf32>
    %94 = math.exp %93 : vector<8x128xf32>
    %cst_24 = arith.constant 1.000000e+00 : f32
    %95 = vector.broadcast %cst_24 : f32 to vector<8x128xf32>
    %96 = arith.addf %95, %94 : vector<8x128xf32>
    %97 = arith.divf %95, %96 : vector<8x128xf32>
    %98 = vector.extract_strided_slice %97 {offsets = [0, 0], sizes = [8, 32], strides = [1, 1]} : vector<8x128xf32> to vector<8x32xf32>
    %99 = vector.extract_strided_slice %97 {offsets = [0, 32], sizes = [8, 32], strides = [1, 1]} : vector<8x128xf32> to vector<8x32xf32>
    %100 = vector.extract_strided_slice %97 {offsets = [0, 64], sizes = [8, 32], strides = [1, 1]} : vector<8x128xf32> to vector<8x32xf32>
    %cst_25 = arith.constant 2.000000e+00 : f32
    %101 = vector.broadcast %cst_25 : f32 to vector<8x32xf32>
    %102 = arith.mulf %101, %100 : vector<8x32xf32>
    %cst_26 = arith.constant 1.000000e+00 : f32
    %103 = vector.broadcast %cst_26 : f32 to vector<8x32xf32>
    %104 = arith.subf %102, %103 : vector<8x32xf32>
    %105 = vector.extract_strided_slice %97 {offsets = [0, 96], sizes = [8, 32], strides = [1, 1]} : vector<8x128xf32> to vector<8x32xf32>
    %106 = arith.mulf %99, %86 : vector<8x32xf32>
    %107 = arith.mulf %98, %104 : vector<8x32xf32>
    %108 = arith.addf %106, %107 : vector<8x32xf32>
    %109 = math.tanh %108 : vector<8x32xf32>
    %110 = arith.mulf %105, %109 : vector<8x32xf32>
    %111 = vector.extract_strided_slice %20 {offsets = [32, 0], sizes = [8, 128], strides = [1, 1]} : vector<64x128xf32> to vector<8x128xf32>
    %112 = arith.truncf %110 : vector<8x32xf32> to vector<8x32xbf16>
    %cst_27 = arith.constant dense<0.000000e+00> : vector<8x128xf32>
    %113 = tpu.matmul %112, %14, %cst_27 {dimension_numbers = #tpu.dot_dimension_numbers<[1], [0], [0], [1], [0, 0, 1, 1], [], []>} : vector<8x32xbf16>, vector<32x128xbf16>, vector<8x128xf32> -> vector<8x128xf32>
    %114 = arith.addf %111, %113 : vector<8x128xf32>
    %115 = arith.negf %114 : vector<8x128xf32>
    %116 = math.exp %115 : vector<8x128xf32>
    %cst_28 = arith.constant 1.000000e+00 : f32
    %117 = vector.broadcast %cst_28 : f32 to vector<8x128xf32>
    %118 = arith.addf %117, %116 : vector<8x128xf32>
    %119 = arith.divf %117, %118 : vector<8x128xf32>
    %120 = vector.extract_strided_slice %119 {offsets = [0, 0], sizes = [8, 32], strides = [1, 1]} : vector<8x128xf32> to vector<8x32xf32>
    %121 = vector.extract_strided_slice %119 {offsets = [0, 32], sizes = [8, 32], strides = [1, 1]} : vector<8x128xf32> to vector<8x32xf32>
    %122 = vector.extract_strided_slice %119 {offsets = [0, 64], sizes = [8, 32], strides = [1, 1]} : vector<8x128xf32> to vector<8x32xf32>
    %cst_29 = arith.constant 2.000000e+00 : f32
    %123 = vector.broadcast %cst_29 : f32 to vector<8x32xf32>
    %124 = arith.mulf %123, %122 : vector<8x32xf32>
    %cst_30 = arith.constant 1.000000e+00 : f32
    %125 = vector.broadcast %cst_30 : f32 to vector<8x32xf32>
    %126 = arith.subf %124, %125 : vector<8x32xf32>
    %127 = vector.extract_strided_slice %119 {offsets = [0, 96], sizes = [8, 32], strides = [1, 1]} : vector<8x128xf32> to vector<8x32xf32>
    %128 = arith.mulf %121, %108 : vector<8x32xf32>
    %129 = arith.mulf %120, %126 : vector<8x32xf32>
    %130 = arith.addf %128, %129 : vector<8x32xf32>
    %131 = math.tanh %130 : vector<8x32xf32>
    %132 = arith.mulf %127, %131 : vector<8x32xf32>
    %133 = vector.extract_strided_slice %20 {offsets = [40, 0], sizes = [8, 128], strides = [1, 1]} : vector<64x128xf32> to vector<8x128xf32>
    %134 = arith.truncf %132 : vector<8x32xf32> to vector<8x32xbf16>
    %cst_31 = arith.constant dense<0.000000e+00> : vector<8x128xf32>
    %135 = tpu.matmul %134, %14, %cst_31 {dimension_numbers = #tpu.dot_dimension_numbers<[1], [0], [0], [1], [0, 0, 1, 1], [], []>} : vector<8x32xbf16>, vector<32x128xbf16>, vector<8x128xf32> -> vector<8x128xf32>
    %136 = arith.addf %133, %135 : vector<8x128xf32>
    %137 = arith.negf %136 : vector<8x128xf32>
    %138 = math.exp %137 : vector<8x128xf32>
    %cst_32 = arith.constant 1.000000e+00 : f32
    %139 = vector.broadcast %cst_32 : f32 to vector<8x128xf32>
    %140 = arith.addf %139, %138 : vector<8x128xf32>
    %141 = arith.divf %139, %140 : vector<8x128xf32>
    %142 = vector.extract_strided_slice %141 {offsets = [0, 0], sizes = [8, 32], strides = [1, 1]} : vector<8x128xf32> to vector<8x32xf32>
    %143 = vector.extract_strided_slice %141 {offsets = [0, 32], sizes = [8, 32], strides = [1, 1]} : vector<8x128xf32> to vector<8x32xf32>
    %144 = vector.extract_strided_slice %141 {offsets = [0, 64], sizes = [8, 32], strides = [1, 1]} : vector<8x128xf32> to vector<8x32xf32>
    %cst_33 = arith.constant 2.000000e+00 : f32
    %145 = vector.broadcast %cst_33 : f32 to vector<8x32xf32>
    %146 = arith.mulf %145, %144 : vector<8x32xf32>
    %cst_34 = arith.constant 1.000000e+00 : f32
    %147 = vector.broadcast %cst_34 : f32 to vector<8x32xf32>
    %148 = arith.subf %146, %147 : vector<8x32xf32>
    %149 = vector.extract_strided_slice %141 {offsets = [0, 96], sizes = [8, 32], strides = [1, 1]} : vector<8x128xf32> to vector<8x32xf32>
    %150 = arith.mulf %143, %130 : vector<8x32xf32>
    %151 = arith.mulf %142, %148 : vector<8x32xf32>
    %152 = arith.addf %150, %151 : vector<8x32xf32>
    %153 = math.tanh %152 : vector<8x32xf32>
    %154 = arith.mulf %149, %153 : vector<8x32xf32>
    %155 = vector.extract_strided_slice %20 {offsets = [48, 0], sizes = [8, 128], strides = [1, 1]} : vector<64x128xf32> to vector<8x128xf32>
    %156 = arith.truncf %154 : vector<8x32xf32> to vector<8x32xbf16>
    %cst_35 = arith.constant dense<0.000000e+00> : vector<8x128xf32>
    %157 = tpu.matmul %156, %14, %cst_35 {dimension_numbers = #tpu.dot_dimension_numbers<[1], [0], [0], [1], [0, 0, 1, 1], [], []>} : vector<8x32xbf16>, vector<32x128xbf16>, vector<8x128xf32> -> vector<8x128xf32>
    %158 = arith.addf %155, %157 : vector<8x128xf32>
    %159 = arith.negf %158 : vector<8x128xf32>
    %160 = math.exp %159 : vector<8x128xf32>
    %cst_36 = arith.constant 1.000000e+00 : f32
    %161 = vector.broadcast %cst_36 : f32 to vector<8x128xf32>
    %162 = arith.addf %161, %160 : vector<8x128xf32>
    %163 = arith.divf %161, %162 : vector<8x128xf32>
    %164 = vector.extract_strided_slice %163 {offsets = [0, 0], sizes = [8, 32], strides = [1, 1]} : vector<8x128xf32> to vector<8x32xf32>
    %165 = vector.extract_strided_slice %163 {offsets = [0, 32], sizes = [8, 32], strides = [1, 1]} : vector<8x128xf32> to vector<8x32xf32>
    %166 = vector.extract_strided_slice %163 {offsets = [0, 64], sizes = [8, 32], strides = [1, 1]} : vector<8x128xf32> to vector<8x32xf32>
    %cst_37 = arith.constant 2.000000e+00 : f32
    %167 = vector.broadcast %cst_37 : f32 to vector<8x32xf32>
    %168 = arith.mulf %167, %166 : vector<8x32xf32>
    %cst_38 = arith.constant 1.000000e+00 : f32
    %169 = vector.broadcast %cst_38 : f32 to vector<8x32xf32>
    %170 = arith.subf %168, %169 : vector<8x32xf32>
    %171 = vector.extract_strided_slice %163 {offsets = [0, 96], sizes = [8, 32], strides = [1, 1]} : vector<8x128xf32> to vector<8x32xf32>
    %172 = arith.mulf %165, %152 : vector<8x32xf32>
    %173 = arith.mulf %164, %170 : vector<8x32xf32>
    %174 = arith.addf %172, %173 : vector<8x32xf32>
    %175 = math.tanh %174 : vector<8x32xf32>
    %176 = arith.mulf %171, %175 : vector<8x32xf32>
    %177 = vector.extract_strided_slice %20 {offsets = [56, 0], sizes = [8, 128], strides = [1, 1]} : vector<64x128xf32> to vector<8x128xf32>
    %178 = arith.truncf %176 : vector<8x32xf32> to vector<8x32xbf16>
    %cst_39 = arith.constant dense<0.000000e+00> : vector<8x128xf32>
    %179 = tpu.matmul %178, %14, %cst_39 {dimension_numbers = #tpu.dot_dimension_numbers<[1], [0], [0], [1], [0, 0, 1, 1], [], []>} : vector<8x32xbf16>, vector<32x128xbf16>, vector<8x128xf32> -> vector<8x128xf32>
    %180 = arith.addf %177, %179 : vector<8x128xf32>
    %181 = arith.negf %180 : vector<8x128xf32>
    %182 = math.exp %181 : vector<8x128xf32>
    %cst_40 = arith.constant 1.000000e+00 : f32
    %183 = vector.broadcast %cst_40 : f32 to vector<8x128xf32>
    %184 = arith.addf %183, %182 : vector<8x128xf32>
    %185 = arith.divf %183, %184 : vector<8x128xf32>
    %186 = vector.extract_strided_slice %185 {offsets = [0, 0], sizes = [8, 32], strides = [1, 1]} : vector<8x128xf32> to vector<8x32xf32>
    %187 = vector.extract_strided_slice %185 {offsets = [0, 32], sizes = [8, 32], strides = [1, 1]} : vector<8x128xf32> to vector<8x32xf32>
    %188 = vector.extract_strided_slice %185 {offsets = [0, 64], sizes = [8, 32], strides = [1, 1]} : vector<8x128xf32> to vector<8x32xf32>
    %cst_41 = arith.constant 2.000000e+00 : f32
    %189 = vector.broadcast %cst_41 : f32 to vector<8x32xf32>
    %190 = arith.mulf %189, %188 : vector<8x32xf32>
    %cst_42 = arith.constant 1.000000e+00 : f32
    %191 = vector.broadcast %cst_42 : f32 to vector<8x32xf32>
    %192 = arith.subf %190, %191 : vector<8x32xf32>
    %193 = vector.extract_strided_slice %185 {offsets = [0, 96], sizes = [8, 32], strides = [1, 1]} : vector<8x128xf32> to vector<8x32xf32>
    %194 = arith.mulf %187, %174 : vector<8x32xf32>
    %195 = arith.mulf %186, %192 : vector<8x32xf32>
    %196 = arith.addf %194, %195 : vector<8x32xf32>
    %197 = math.tanh %196 : vector<8x32xf32>
    %198 = arith.mulf %193, %197 : vector<8x32xf32>
    %cst_43 = arith.constant dense<0xFF800000> : vector<8xf32>
    %199 = vector.multi_reduction <maximumf>, %198, %cst_43 [1] : vector<8x32xf32> to vector<8xf32>
    %200 = vector.shape_cast %199 : vector<8xf32> to vector<8x1xf32>
    %201 = vector.broadcast %200 : vector<8x1xf32> to vector<8x32xf32>
    %202 = arith.subf %198, %201 : vector<8x32xf32>
    %203 = math.exp %202 : vector<8x32xf32>
    %cst_44 = arith.constant dense<0.000000e+00> : vector<8xf32>
    %204 = vector.multi_reduction <add>, %203, %cst_44 [1] : vector<8x32xf32> to vector<8xf32>
    %205 = vector.shape_cast %204 : vector<8xf32> to vector<8x1xf32>
    %206 = tpu.reciprocal %205 {approx = true} : vector<8x1xf32> -> vector<8x1xf32>
    %207 = vector.broadcast %206 : vector<8x1xf32> to vector<8x32xf32>
    %208 = arith.mulf %203, %207 : vector<8x32xf32>
    %c0_45 = arith.constant 0 : index
    %c0_46 = arith.constant 0 : index
    %209 = vector.load %arg5[%c0_45, %c0_46] : memref<8x32xf32, #tpu.memory_space<vmem>>, vector<8x32xf32>
    tpu.vector_store %arg5[%c0_45, %c0_46], %208 {strides = array<i32>} : memref<8x32xf32, #tpu.memory_space<vmem>>, vector<8x32xf32>,
    return
  }
  func.func @transform_0(%arg0: i32) -> (i32, i32) {
    %c0_i32 = arith.constant 0 : i32
    %c0_i32_0 = arith.constant 0 : i32
    %c0_i32_1 = arith.constant 0 : i32
    return %c0_i32, %c0_i32_0 : i32, i32
  }
  func.func @transform_1(%arg0: i32) -> (i32, i32) {
    %c0_i32 = arith.constant 0 : i32
    %c0_i32_0 = arith.constant 0 : i32
    %c0_i32_1 = arith.constant 0 : i32
    return %c0_i32, %c0_i32_0 : i32, i32
  }
  func.func @transform_2(%arg0: i32) -> (i32, i32) {
    %c0_i32 = arith.constant 0 : i32
    %c0_i32_0 = arith.constant 0 : i32
    %c0_i32_1 = arith.constant 0 : i32
    return %c0_i32, %c0_i32_0 : i32, i32
  }
  func.func @transform_3(%arg0: i32) -> (i32, i32) {
    %c0_i32 = arith.constant 0 : i32
    %c0_i32_0 = arith.constant 0 : i32
    %c0_i32_1 = arith.constant 0 : i32
    return %c0_i32, %c0_i32_0 : i32, i32
  }
  func.func @transform_4(%arg0: i32) -> (i32, i32) {
    %c0_i32 = arith.constant 0 : i32
    %c0_i32_0 = arith.constant 0 : i32
    %c0_i32_1 = arith.constant 0 : i32
    return %c0_i32, %c0_i32_0 : i32, i32
  }
}

</mosaic_0001>

<bundles_post_ra>
// kernel: tpu_custom_call.1
= control target key start
LH: loop header
LB: loop body
LE: loop exit
PB: predicated region body
PF: predicated region fallthrough
CT: control target
= control target key end

     0   :  { %v25_v1 = vlaneseq  ;;  %vm79_vm0 = vcmask 1043456   ;;  %vm54_vm1 = vcmask 31744   ;;  %s930_s0 = inlined_call_operand.vmem [shape: f32[64,4], index: 0, kind: input, shape index: {}]   ;;  %s931_s1 = inlined_call_operand.vmem [shape: f32[4,128], index: 1, kind: input, shape index: {}]   ;;  %s932_s2 = inlined_call_operand.vmem [shape: bf16[32,128], index: 2, kind: input, shape index: {}]   ;;  %s933_s3 = inlined_call_operand.vmem [shape: f32[1,128], index: 3, kind: input, shape index: {}]   ;;  %s934_s4 = inlined_call_operand.hbm [shape: f32[8,32], index: 4, kind: output, shape index: {}]  }
   0x1   :  { %v678_v0 = vld [vmem:[%s932_s2 + $0x8] sm:$0xff]   ;;  %v19_v2 = vld [vmem:[%s931_s1] sm:$0xf] }
   0x2   :  { %v43_v3 = vld [vmem:[%s930_s0] sm:$0xff]  ;;  %638 = vmatpush.msk.msra.mxu0 %vm79_vm0, %v19_v2  ;;  %679 = vmatpush.msk.msra.mxu3 %vm79_vm0, %v19_v2  ;;  %v26_v5 = vand.u32 127, %v25_v1 }
   0x3   :  { %v671_v4 = vld [vmem:[%s932_s2] sm:$0xff]   ;;  %639 = vmatmul.msk.f32.vlgmr.msra.gmra.mxu0 %vm54_vm1, %v43_v3 }
   0x4   :  { %9 = vsyncpa [#allocation3], 0  ;;  %v676_v6 = vunpack.c.l.bf16 %v678_v0  ;;  %v677_v7 = vunpack.c.h.bf16 %v678_v0  ;;  %v672_v8 = vunpack.c.l.bf16 %v671_v4  ;;  %v673_v9 = vunpack.c.h.bf16 %v671_v4  ;;  %v832_v19 = vld [vmem:[%s933_s3] ss:$0 sm:$0xff]  ;;  %s766_s3 = smov 64   ;;  %s767_s23 = smov 32  }
   0x5   :  { %vm27_vm2 = vcmp.ge.s32.totalorder %v26_v5, 64  ;;  %vm28_vm3 = vcmp.lt.s32.totalorder %v26_v5, 96  ;;  %v764_v10 = vmov 1.0   ;;  %v765_v18 = vmov 0   ;;  %v44_v50 = vld [vmem:[%s930_s0 + $0x8] sm:$0xff]  ;;  %s629_s15 = sshll.u32 %s934_s4, 4  ;;  %s630_s15 = int_to_ptr.hbm [resolvable:$true] %s629_s15 }
   0x6   :  { %vm29_vm4 = vmand %vm27_vm2, %vm28_vm3  ;;  %vm132_vm9 = vcmask 261120  }
   0x7   :  { %v807_v11 = vsel %vm29_vm4, 2.0, %v764_v10 }
   0x8   :  { %v39_v12 = vmul.f32 %v676_v6, %v807_v11  ;;  %v40_v13 = vmul.f32 %v677_v7, %v807_v11  ;;  %v37_v14 = vmul.f32 %v672_v8, %v807_v11  ;;  %v38_v15 = vmul.f32 %v673_v9, %v807_v11 }
   0xa   :  { %v813_v16 = vpack.c.bf16 %v40_v13, %v39_v12  ;;  %v816_v17 = vpack.c.bf16 %v38_v15, %v37_v14 }
   0xb   :  { %640 = vmatmul.msk.f32.gmra.mxu0 %vm54_vm1, %v44_v50 }
   0xc   :  { %142 = vmatpush.bf16.msra.mxu1 %v813_v16  ;;  %201 = vmatpush.bf16.msra.mxu2 %v813_v16 }
   0xd   :  { %260 = vmatpush.bf16.msrb.mxu3 %v813_v16 }
  0x10   :  { %143 = vmatpush.bf16.msra.mxu1 %v816_v17  ;;  %202 = vmatpush.bf16.msra.mxu2 %v816_v17 }
  0x11   :  { %261 = vmatpush.bf16.msrb.mxu3 %v816_v17 }
  0x13   :  { %144 = vmatmul.bf16.vlgmr.msra.gmra.mxu1 %v765_v18  ;;  %v50_v18 = vld [vmem:[%s930_s0 + $0x38] sm:$0xff] }
  0x14   :  { %319 = vmatpush.bf16.msrb.mxu1 %v813_v16  ;;  %378 = vmatpush.bf16.msrb.mxu2 %v813_v16 }
  0x15   :  { %646 = vmatmul.msk.f32.vlgmr.msra.gmra.mxu3 %vm54_vm1, %v50_v18 }
  0x16   :  { %437 = vmatpush.bf16.msra.mxu3 %v813_v16 }
  0x18   :  { %320 = vmatpush.bf16.msrb.mxu1 %v816_v17  ;;  %379 = vmatpush.bf16.msrb.mxu2 %v816_v17 }
  0x1a   :  { %438 = vmatpush.bf16.msra.mxu3 %v816_v17 }
  0x1c   :  { %496 = vmatpush.bf16.msra.mxu1 %v813_v16 }
  0x20   :  { %497 = vmatpush.bf16.msra.mxu1 %v816_v17 }
  0x80   :  { %v100_v20 = vpop.f32.mrf.mxu0 }
  0x81   :  { %v101_v21 = vadd.f32 %v832_v19, %v100_v20 }
  0x83   :  { %v124_v22 = vmul.f32 %v101_v21, %v807_v11 }
  0x88   :  { %v103_v52 = vpop.f32.mrf.mxu0 }
  0x89   :  { %v104_v53 = vadd.f32 %v832_v19, %v103_v52 }
  0x8b   :  { %v125_v54 = vmul.f32 %v104_v53, %v807_v11 }
  0x90   :  { %v145_v23 = vpop.f32.mrf.mxu1 }
  0x91   :  { %v149_v24 = vadd.f32 %v145_v23, %v124_v22  ;;  %v45_v23 = vld [vmem:[%s930_s0 + $0x10] sm:$0xff] }
  0x92   :  { %641 = vmatmul.msk.f32.gmra.mxu0 %vm54_vm1, %v45_v23 }
  0x93   :  { %v647_v25 = vmul.f32 -1.442695, %v149_v24 }
  0x95   :  { %686 = vpow2.f32 %v647_v25 }
  0x98   :  { %v147_v26 = vpop.f32.mrf.mxu1  ;;  %v864_v25 = vpop.f32.mrf.mxu3 }
  0x9b   :  { %v687_v27 = vpop.eup %686 }
  0x9c   :  { %v153_v28 = vadd.f32 1.0, %v687_v27 }
  0x9e   :  { %688 = vrcp.f32 %v153_v28  ;;  %v165_v32 = vand.u32 2147483648, %v153_v28  ;;  %v163_v34 = vand.u32 2147483647, %v153_v28  ;;  %vm159_vm6 = vweird.f32 %v153_v28 }
  0xa0   :  { %v166_v36 = vor.u32 1.1754944e-38, %v165_v32  ;;  %vm164_vm8 = vcmp.eq.f32.partialorder %v163_v34, 8.507059e+37 }
  0xa4   :  { %v689_v29 = vpop.eup %688 }
  0xa5   :  { %v155_v30 = vmul.f32 %v689_v29, %v153_v28  ;;  %vm160_vm5 = vweird.f32 %v689_v29 }
  0xa6   :  { %vm161_vm7 = vmor %vm159_vm6, %vm160_vm5 }
  0xa7   :  { %v156_v31 = vsub.f32 1.0, %v155_v30 }
  0xa9   :  { %v157_v33 = vmul.f32 %v689_v29, %v156_v31 }
  0xab   :  { %v158_v35 = vadd.f32 %v689_v29, %v157_v33 }
  0xad   :  { %v162_v37 = vsel %vm161_vm7, %v689_v29, %v158_v35 }
  0xae   :  { %v167_v38 = vsel %vm164_vm8, %v166_v36, %v162_v37 }
  0xaf   :  { %v169_v39 = vmul.f32 2.0, %v167_v38  ;;  %v171_v43 = vmul.f32 0.0, %v167_v38 }
  0xb1   :  { %v648_v40 = vadd.f32 -1.0, %v169_v39 }
  0xb3   :  { %173 = vrot.lane.b32.xlu0 %v648_v40, %s766_s3 }
 0x10f   :  { %v106_v26 = vpop.f32.mrf.mxu0 }
 0x125   :  { %v174_v41 = vpop.permute.xlu0 %173 }
 0x126   :  { %v176_v42 = vmul.f32 %v174_v41, %v167_v38 }
 0x128   :  { %178 = vrot.lane.b32.xlu0 %v176_v42, %s767_s23 }
 0x19a   :  { %v179_v44 = vpop.permute.xlu0 %178 }
 0x19b   :  { %v181_v45 = vadd.f32 %v179_v44, %v171_v43 }
 0x19d   :  { %690 = vtanh.f32 %v181_v45 }
 0x1a3   :  { %v691_v46 = vpop.eup %690 }
 0x1a4   :  { %184 = vrot.lane.b32.xlu1 %v691_v46, %s766_s3 }
 0x216   :  { %v185_v47 = vpop.permute.xlu1 %184 }
 0x217   :  { %v187_v48 = vmul.f32 %v185_v47, %v167_v38 }
 0x219   :  { %v188_v49 = vpack.c.bf16 %v187_v48, %v187_v48 }
 0x21b   :  { %190 = vrot.lane.b32.xlu1 %v188_v49, %s767_s23 }
 0x28d   :  { %v191_v51 = vpop.permute.xlu1 %190 }
 0x28e   :  { %649 = vmatmul.msk.bf16.vlgmr.msra.gmra.mxu2 %vm132_vm9, %v191_v51  ;;  %v46_v51 = vld [vmem:[%s930_s0 + $0x18] sm:$0xff] }
 0x28f   :  { %555 = vmatpush.bf16.msra.mxu2 %v813_v16  ;;  %v107_v16 = vadd.f32 %v832_v19, %v106_v26  ;;  %642 = vmatmul.msk.f32.gmra.mxu0 %vm54_vm1, %v46_v51 }
 0x293   :  { %556 = vmatpush.bf16.msra.mxu2 %v816_v17  ;;  %v126_v17 = vmul.f32 %v107_v16, %v807_v11  ;;  %v47_v16 = vld [vmem:[%s930_s0 + $0x20] sm:$0xff] }
 0x297   :  { %643 = vmatmul.msk.f32.gmra.mxu0 %vm54_vm1, %v47_v16  ;;  %v49_v16 = vld [vmem:[%s930_s0 + $0x30] sm:$0xff] }
 0x311   :  { %v204_v55 = vpop.f32.mrf.mxu2 }
 0x312   :  { %v208_v56 = vadd.f32 %v204_v55, %v125_v54 }
 0x314   :  { %v650_v57 = vmul.f32 -1.442695, %v208_v56  ;;  %v109_v56 = vpop.f32.mrf.mxu0 }
 0x316   :  { %692 = vpow2.f32 %v650_v57  ;;  %v110_v57 = vadd.f32 %v832_v19, %v109_v56 }
 0x319   :  { %v206_v58 = vpop.f32.mrf.mxu2 }
 0x31a   :  { %v127_v58 = vmul.f32 %v110_v57, %v807_v11  ;;  %v48_v57 = vld [vmem:[%s930_s0 + $0x28] sm:$0xff]  ;;  %s768_s0 = smov [#allocation2]  }
 0x31b   :  { %644 = vmatmul.msk.f32.gmra.mxu0 %vm54_vm1, %v48_v57  ;;  %s627_s12 = sshll.u32 %s768_s0, 4  ;;  %s628_s12 = int_to_ptr.vmem [resolvable:$true] %s627_s12 }
 0x31c   :  { %v693_v59 = vpop.eup %692 }
 0x31d   :  { %v212_v60 = vadd.f32 1.0, %v693_v59 }
 0x31f   :  { %694 = vrcp.f32 %v212_v60  ;;  %v224_v0 = vand.u32 2147483648, %v212_v60  ;;  %v222_v2 = vand.u32 2147483647, %v212_v60  ;;  %vm218_vm11 = vweird.f32 %v212_v60 }
 0x321   :  { %v225_v4 = vor.u32 1.1754944e-38, %v224_v0  ;;  %vm223_vm13 = vcmp.eq.f32.partialorder %v222_v2, 8.507059e+37 }
 0x323   :  { %645 = vmatmul.msk.f32.gmra.mxu0 %vm54_vm1, %v49_v16 }
 0x325   :  { %v695_v61 = vpop.eup %694 }
 0x326   :  { %v214_v62 = vmul.f32 %v695_v61, %v212_v60  ;;  %vm219_vm10 = vweird.f32 %v695_v61 }
 0x327   :  { %vm220_vm12 = vmor %vm218_vm11, %vm219_vm10 }
 0x328   :  { %v215_v63 = vsub.f32 1.0, %v214_v62 }
 0x32a   :  { %v216_v1 = vmul.f32 %v695_v61, %v215_v63 }
 0x32c   :  { %v217_v3 = vadd.f32 %v695_v61, %v216_v1 }
 0x32e   :  { %v221_v5 = vsel %vm220_vm12, %v695_v61, %v217_v3 }
 0x32f   :  { %v226_v6 = vsel %vm223_vm13, %v225_v4, %v221_v5 }
 0x330   :  { %v228_v7 = vmul.f32 2.0, %v226_v6  ;;  %v230_v12 = vmul.f32 %v226_v6, %v181_v45 }
 0x332   :  { %v651_v8 = vadd.f32 -1.0, %v228_v7 }
 0x334   :  { %232 = vrot.lane.b32.xlu2 %v651_v8, %s766_s3 }
 0x38e   :  { %v233_v9 = vpop.permute.xlu2 %232 }
 0x38f   :  { %v235_v10 = vmul.f32 %v233_v9, %v226_v6 }
 0x391   :  { %237 = vrot.lane.b32.xlu2 %v235_v10, %s767_s23 }
 0x3eb   :  { %v238_v13 = vpop.permute.xlu2 %237 }
 0x3ec   :  { %v240_v14 = vadd.f32 %v238_v13, %v230_v12 }
 0x3ee   :  { %696 = vtanh.f32 %v240_v14 }
 0x3f4   :  { %v697_v15 = vpop.eup %696 }
 0x3f5   :  { %243 = vrot.lane.b32.xlu0 %v697_v15, %s766_s3 }
 0x467   :  { %v244_v20 = vpop.permute.xlu0 %243 }
 0x468   :  { %v246_v21 = vmul.f32 %v244_v20, %v226_v6 }
 0x46a   :  { %v247_v22 = vpack.c.bf16 %v246_v21, %v246_v21 }
 0x46c   :  { %249 = vrot.lane.b32.xlu1 %v247_v22, %s767_s23 }
 0x4de   :  { %v250_v24 = vpop.permute.xlu1 %249 }
 0x4df   :  { %652 = vmatmul.msk.bf16.vlgmr.msrb.gmra.mxu3 %vm132_vm9, %v250_v24 }
 0x562   :  { %v263_v27 = vpop.f32.mrf.mxu3 }
 0x563   :  { %v267_v28 = vadd.f32 %v263_v27, %v126_v17  ;;  %v112_v27 = vpop.f32.mrf.mxu0 }
 0x565   :  { %v653_v29 = vmul.f32 -1.442695, %v267_v28  ;;  %v113_v28 = vadd.f32 %v832_v19, %v112_v27 }
 0x567   :  { %698 = vpow2.f32 %v653_v29  ;;  %v128_v29 = vmul.f32 %v113_v28, %v807_v11 }
 0x56a   :  { %v265_v30 = vpop.f32.mrf.mxu3 }
 0x56d   :  { %v699_v31 = vpop.eup %698 }
 0x56e   :  { %v271_v32 = vadd.f32 1.0, %v699_v31 }
 0x570   :  { %700 = vrcp.f32 %v271_v32  ;;  %v283_v36 = vand.u32 2147483648, %v271_v32  ;;  %v281_v38 = vand.u32 2147483647, %v271_v32  ;;  %vm277_vm15 = vweird.f32 %v271_v32 }
 0x572   :  { %v284_v40 = vor.u32 1.1754944e-38, %v283_v36  ;;  %vm282_vm2 = vcmp.eq.f32.partialorder %v281_v38, 8.507059e+37 }
 0x576   :  { %v701_v33 = vpop.eup %700 }
 0x577   :  { %v273_v34 = vmul.f32 %v701_v33, %v271_v32  ;;  %vm278_vm14 = vweird.f32 %v701_v33 }
 0x578   :  { %vm279_vm0 = vmor %vm277_vm15, %vm278_vm14 }
 0x579   :  { %v274_v35 = vsub.f32 1.0, %v273_v34 }
 0x57b   :  { %v275_v37 = vmul.f32 %v701_v33, %v274_v35 }
 0x57d   :  { %v276_v39 = vadd.f32 %v701_v33, %v275_v37 }
 0x57f   :  { %v280_v41 = vsel %vm279_vm0, %v701_v33, %v276_v39 }
 0x580   :  { %v285_v42 = vsel %vm282_vm2, %v284_v40, %v280_v41 }
 0x581   :  { %v287_v43 = vmul.f32 2.0, %v285_v42  ;;  %v289_v47 = vmul.f32 %v285_v42, %v240_v14 }
 0x583   :  { %v654_v44 = vadd.f32 -1.0, %v287_v43 }
 0x585   :  { %291 = vrot.lane.b32.xlu2 %v654_v44, %s766_s3 }
 0x5df   :  { %v292_v45 = vpop.permute.xlu2 %291 }
 0x5e0   :  { %v294_v46 = vmul.f32 %v292_v45, %v285_v42 }
 0x5e2   :  { %296 = vrot.lane.b32.xlu0 %v294_v46, %s767_s23 }
 0x654   :  { %v297_v48 = vpop.permute.xlu0 %296 }
 0x655   :  { %v299_v49 = vadd.f32 %v297_v48, %v289_v47 }
 0x657   :  { %702 = vtanh.f32 %v299_v49 }
 0x65d   :  { %v703_v50 = vpop.eup %702 }
 0x65e   :  { %302 = vrot.lane.b32.xlu1 %v703_v50, %s766_s3 }
 0x6d0   :  { %v303_v52 = vpop.permute.xlu1 %302 }
 0x6d1   :  { %v305_v53 = vmul.f32 %v303_v52, %v285_v42 }
 0x6d3   :  { %v306_v54 = vpack.c.bf16 %v305_v53, %v305_v53 }
 0x6d5   :  { %308 = vrot.lane.b32.xlu2 %v306_v54, %s767_s23 }
 0x72f   :  { %v309_v55 = vpop.permute.xlu2 %308 }
 0x730   :  { %655 = vmatmul.msk.bf16.vlgmr.msrb.gmra.mxu1 %vm132_vm9, %v309_v55 }
 0x7ad   :  { %v322_v59 = vpop.f32.mrf.mxu1 }
 0x7ae   :  { %v326_v60 = vadd.f32 %v322_v59, %v127_v58  ;;  %v115_v59 = vpop.f32.mrf.mxu0 }
 0x7b0   :  { %v656_v61 = vmul.f32 -1.442695, %v326_v60  ;;  %v116_v60 = vadd.f32 %v832_v19, %v115_v59 }
 0x7b2   :  { %704 = vpow2.f32 %v656_v61  ;;  %v129_v61 = vmul.f32 %v116_v60, %v807_v11 }
 0x7b5   :  { %v324_v62 = vpop.f32.mrf.mxu1 }
 0x7b8   :  { %v705_v63 = vpop.eup %704 }
 0x7b9   :  { %v330_v0 = vadd.f32 1.0, %v705_v63 }
 0x7bb   :  { %706 = vrcp.f32 %v330_v0  ;;  %v342_v4 = vand.u32 2147483648, %v330_v0  ;;  %v340_v6 = vand.u32 2147483647, %v330_v0  ;;  %vm336_vm4 = vweird.f32 %v330_v0 }
 0x7bd   :  { %v343_v8 = vor.u32 1.1754944e-38, %v342_v4  ;;  %vm341_vm6 = vcmp.eq.f32.partialorder %v340_v6, 8.507059e+37 }
 0x7c1   :  { %v707_v1 = vpop.eup %706 }
 0x7c2   :  { %v332_v2 = vmul.f32 %v707_v1, %v330_v0  ;;  %vm337_vm3 = vweird.f32 %v707_v1 }
 0x7c3   :  { %vm338_vm5 = vmor %vm336_vm4, %vm337_vm3 }
 0x7c4   :  { %v333_v3 = vsub.f32 1.0, %v332_v2 }
 0x7c6   :  { %v334_v5 = vmul.f32 %v707_v1, %v333_v3 }
 0x7c8   :  { %v335_v7 = vadd.f32 %v707_v1, %v334_v5 }
 0x7ca   :  { %v339_v9 = vsel %vm338_vm5, %v707_v1, %v335_v7 }
 0x7cb   :  { %v344_v10 = vsel %vm341_vm6, %v343_v8, %v339_v9 }
 0x7cc   :  { %v346_v12 = vmul.f32 2.0, %v344_v10  ;;  %v348_v18 = vmul.f32 %v344_v10, %v299_v49 }
 0x7ce   :  { %v657_v13 = vadd.f32 -1.0, %v346_v12 }
 0x7d0   :  { %350 = vrot.lane.b32.xlu0 %v657_v13, %s766_s3 }
 0x842   :  { %v351_v14 = vpop.permute.xlu0 %350 }
 0x843   :  { %v353_v15 = vmul.f32 %v351_v14, %v344_v10 }
 0x845   :  { %355 = vrot.lane.b32.xlu1 %v353_v15, %s767_s23 }
 0x8b7   :  { %v356_v20 = vpop.permute.xlu1 %355 }
 0x8b8   :  { %v358_v21 = vadd.f32 %v356_v20, %v348_v18 }
 0x8ba   :  { %708 = vtanh.f32 %v358_v21 }
 0x8c0   :  { %v709_v22 = vpop.eup %708 }
 0x8c1   :  { %361 = vrot.lane.b32.xlu2 %v709_v22, %s766_s3 }
 0x91b   :  { %v362_v23 = vpop.permute.xlu2 %361 }
 0x91c   :  { %v364_v24 = vmul.f32 %v362_v23, %v344_v10 }
 0x91e   :  { %v365_v26 = vpack.c.bf16 %v364_v24, %v364_v24 }
 0x920   :  { %367 = vrot.lane.b32.xlu0 %v365_v26, %s767_s23 }
 0x992   :  { %v368_v17 = vpop.permute.xlu0 %367 }
 0x993   :  { %658 = vmatmul.msk.bf16.vlgmr.msrb.gmra.mxu2 %vm132_vm9, %v368_v17 }
 0xa16   :  { %v381_v30 = vpop.f32.mrf.mxu2 }
 0xa17   :  { %v385_v31 = vadd.f32 %v381_v30, %v128_v29  ;;  %v118_v30 = vpop.f32.mrf.mxu0 }
 0xa19   :  { %v659_v32 = vmul.f32 -1.442695, %v385_v31  ;;  %v119_v31 = vadd.f32 %v832_v19, %v118_v30 }
 0xa1b   :  { %710 = vpow2.f32 %v659_v32  ;;  %v130_v32 = vmul.f32 %v119_v31, %v807_v11 }
 0xa1e   :  { %v383_v33 = vpop.f32.mrf.mxu2 }
 0xa21   :  { %v711_v34 = vpop.eup %710 }
 0xa22   :  { %v389_v35 = vadd.f32 1.0, %v711_v34 }
 0xa24   :  { %712 = vrcp.f32 %v389_v35  ;;  %v401_v39 = vand.u32 2147483648, %v389_v35  ;;  %v399_v41 = vand.u32 2147483647, %v389_v35  ;;  %vm395_vm8 = vweird.f32 %v389_v35 }
 0xa26   :  { %v402_v43 = vor.u32 1.1754944e-38, %v401_v39  ;;  %vm400_vm11 = vcmp.eq.f32.partialorder %v399_v41, 8.507059e+37 }
 0xa2a   :  { %v713_v36 = vpop.eup %712 }
 0xa2b   :  { %v391_v37 = vmul.f32 %v713_v36, %v389_v35  ;;  %vm396_vm7 = vweird.f32 %v713_v36 }
 0xa2c   :  { %vm397_vm10 = vmor %vm395_vm8, %vm396_vm7  ;;  %vm601_vm8 = vcmask 1048320  }
 0xa2d   :  { %v392_v38 = vsub.f32 1.0, %v391_v37 }
 0xa2f   :  { %v393_v40 = vmul.f32 %v713_v36, %v392_v38 }
 0xa31   :  { %v394_v42 = vadd.f32 %v713_v36, %v393_v40 }
 0xa33   :  { %v398_v44 = vsel %vm397_vm10, %v713_v36, %v394_v42 }
 0xa34   :  { %v403_v45 = vsel %vm400_vm11, %v402_v43, %v398_v44 }
 0xa35   :  { %v405_v46 = vmul.f32 2.0, %v403_v45  ;;  %v407_v50 = vmul.f32 %v403_v45, %v358_v21 }
 0xa37   :  { %v660_v47 = vadd.f32 -1.0, %v405_v46 }
 0xa39   :  { %409 = vrot.lane.b32.xlu1 %v660_v47, %s766_s3 }
 0xaab   :  { %v410_v48 = vpop.permute.xlu1 %409 }
 0xaac   :  { %v412_v49 = vmul.f32 %v410_v48, %v403_v45 }
 0xaae   :  { %414 = vrot.lane.b32.xlu2 %v412_v49, %s767_s23 }
 0xb08   :  { %v415_v51 = vpop.permute.xlu2 %414 }
 0xb09   :  { %v417_v52 = vadd.f32 %v415_v51, %v407_v50 }
 0xb0b   :  { %714 = vtanh.f32 %v417_v52 }
 0xb11   :  { %v715_v53 = vpop.eup %714 }
 0xb12   :  { %420 = vrot.lane.b32.xlu0 %v715_v53, %s766_s3 }
 0xb84   :  { %v421_v54 = vpop.permute.xlu0 %420 }
 0xb85   :  { %v423_v55 = vmul.f32 %v421_v54, %v403_v45 }
 0xb87   :  { %v424_v56 = vpack.c.bf16 %v423_v55, %v423_v55 }
 0xb89   :  { %426 = vrot.lane.b32.xlu1 %v424_v56, %s767_s23 }
 0xbfb   :  { %v427_v58 = vpop.permute.xlu1 %426 }
 0xbfc   :  { %661 = vmatmul.msk.bf16.vlgmr.msra.gmra.mxu3 %vm132_vm9, %v427_v58 }
 0xc7f   :  { %v440_v62 = vpop.f32.mrf.mxu3 }
 0xc80   :  { %v444_v63 = vadd.f32 %v440_v62, %v129_v61  ;;  %v122_v61 = vadd.f32 %v832_v19, %v864_v25 }
 0xc82   :  { %v662_v0 = vmul.f32 -1.442695, %v444_v63  ;;  %v131_v62 = vmul.f32 %v122_v61, %v807_v11 }
 0xc84   :  { %716 = vpow2.f32 %v662_v0 }
 0xc87   :  { %v442_v1 = vpop.f32.mrf.mxu3 }
 0xc8a   :  { %v717_v2 = vpop.eup %716 }
 0xc8b   :  { %v448_v3 = vadd.f32 1.0, %v717_v2 }
 0xc8d   :  { %718 = vrcp.f32 %v448_v3  ;;  %v460_v7 = vand.u32 2147483648, %v448_v3  ;;  %v458_v9 = vand.u32 2147483647, %v448_v3  ;;  %vm454_vm13 = vweird.f32 %v448_v3 }
 0xc8f   :  { %v461_v12 = vor.u32 1.1754944e-38, %v460_v7  ;;  %vm459_vm15 = vcmp.eq.f32.partialorder %v458_v9, 8.507059e+37 }
 0xc93   :  { %v719_v4 = vpop.eup %718 }
 0xc94   :  { %v450_v5 = vmul.f32 %v719_v4, %v448_v3  ;;  %vm455_vm12 = vweird.f32 %v719_v4 }
 0xc95   :  { %vm456_vm14 = vmor %vm454_vm13, %vm455_vm12 }
 0xc96   :  { %v451_v6 = vsub.f32 1.0, %v450_v5 }
 0xc98   :  { %v452_v8 = vmul.f32 %v719_v4, %v451_v6 }
 0xc9a   :  { %v453_v10 = vadd.f32 %v719_v4, %v452_v8 }
 0xc9c   :  { %v457_v13 = vsel %vm456_vm14, %v719_v4, %v453_v10 }
 0xc9d   :  { %v462_v14 = vsel %vm459_vm15, %v461_v12, %v457_v13 }
 0xc9e   :  { %v464_v15 = vmul.f32 2.0, %v462_v14  ;;  %v466_v22 = vmul.f32 %v462_v14, %v417_v52 }
 0xca0   :  { %v663_v18 = vadd.f32 -1.0, %v464_v15 }
 0xca2   :  { %468 = vrot.lane.b32.xlu2 %v663_v18, %s766_s3 }
 0xcfc   :  { %v469_v20 = vpop.permute.xlu2 %468 }
 0xcfd   :  { %v471_v21 = vmul.f32 %v469_v20, %v462_v14 }
 0xcff   :  { %473 = vrot.lane.b32.xlu0 %v471_v21, %s767_s23 }
 0xd71   :  { %v474_v23 = vpop.permute.xlu0 %473 }
 0xd72   :  { %v476_v24 = vadd.f32 %v474_v23, %v466_v22 }
 0xd74   :  { %720 = vtanh.f32 %v476_v24 }
 0xd7a   :  { %v721_v26 = vpop.eup %720 }
 0xd7b   :  { %479 = vrot.lane.b32.xlu1 %v721_v26, %s766_s3 }
 0xded   :  { %v480_v17 = vpop.permute.xlu1 %479 }
 0xdee   :  { %v482_v27 = vmul.f32 %v480_v17, %v462_v14 }
 0xdf0   :  { %v483_v28 = vpack.c.bf16 %v482_v27, %v482_v27 }
 0xdf2   :  { %485 = vrot.lane.b32.xlu2 %v483_v28, %s767_s23 }
 0xe4c   :  { %v486_v29 = vpop.permute.xlu2 %485 }
 0xe4d   :  { %664 = vmatmul.msk.bf16.vlgmr.msra.gmra.mxu1 %vm132_vm9, %v486_v29 }
 0xeca   :  { %v499_v33 = vpop.f32.mrf.mxu1 }
 0xecb   :  { %v503_v34 = vadd.f32 %v499_v33, %v130_v32 }
 0xecd   :  { %v665_v35 = vmul.f32 -1.442695, %v503_v34 }
 0xecf   :  { %722 = vpow2.f32 %v665_v35 }
 0xed2   :  { %v501_v36 = vpop.f32.mrf.mxu1 }
 0xed5   :  { %v723_v37 = vpop.eup %722 }
 0xed6   :  { %v507_v38 = vadd.f32 1.0, %v723_v37 }
 0xed8   :  { %724 = vrcp.f32 %v507_v38  ;;  %v519_v42 = vand.u32 2147483648, %v507_v38  ;;  %v517_v44 = vand.u32 2147483647, %v507_v38  ;;  %vm513_vm0 = vweird.f32 %v507_v38 }
 0xeda   :  { %v520_v46 = vor.u32 1.1754944e-38, %v519_v42  ;;  %vm518_vm3 = vcmp.eq.f32.partialorder %v517_v44, 8.507059e+37 }
 0xede   :  { %v725_v39 = vpop.eup %724 }
 0xedf   :  { %v509_v40 = vmul.f32 %v725_v39, %v507_v38  ;;  %vm514_vm1 = vweird.f32 %v725_v39 }
 0xee0   :  { %vm515_vm2 = vmor %vm513_vm0, %vm514_vm1 }
 0xee1   :  { %v510_v41 = vsub.f32 1.0, %v509_v40 }
 0xee3   :  { %v511_v43 = vmul.f32 %v725_v39, %v510_v41 }
 0xee5   :  { %v512_v45 = vadd.f32 %v725_v39, %v511_v43 }
 0xee7   :  { %v516_v47 = vsel %vm515_vm2, %v725_v39, %v512_v45 }
 0xee8   :  { %v521_v48 = vsel %vm518_vm3, %v520_v46, %v516_v47 }
 0xee9   :  { %v523_v49 = vmul.f32 2.0, %v521_v48  ;;  %v525_v53 = vmul.f32 %v521_v48, %v476_v24 }
 0xeeb   :  { %v666_v50 = vadd.f32 -1.0, %v523_v49 }
 0xeed   :  { %527 = vrot.lane.b32.xlu0 %v666_v50, %s766_s3 }
 0xf5f   :  { %v528_v51 = vpop.permute.xlu0 %527 }
 0xf60   :  { %v530_v52 = vmul.f32 %v528_v51, %v521_v48 }
 0xf62   :  { %532 = vrot.lane.b32.xlu1 %v530_v52, %s767_s23 }
 0xfd4   :  { %v533_v54 = vpop.permute.xlu1 %532 }
 0xfd5   :  { %v535_v55 = vadd.f32 %v533_v54, %v525_v53 }
 0xfd7   :  { %726 = vtanh.f32 %v535_v55 }
 0xfdd   :  { %v727_v56 = vpop.eup %726 }
 0xfde   :  { %538 = vrot.lane.b32.xlu2 %v727_v56, %s766_s3 }
0x1038   :  { %v539_v57 = vpop.permute.xlu2 %538 }
0x1039   :  { %v541_v58 = vmul.f32 %v539_v57, %v521_v48 }
0x103b   :  { %v542_v59 = vpack.c.bf16 %v541_v58, %v541_v58 }
0x103d   :  { %544 = vrot.lane.b32.xlu0 %v542_v59, %s767_s23 }
0x10af   :  { %v545_v60 = vpop.permute.xlu0 %544 }
0x10b0   :  { %667 = vmatmul.msk.bf16.vlgmr.msra.gmra.mxu2 %vm132_vm9, %v545_v60 }
0x1133   :  { %v558_v63 = vpop.f32.mrf.mxu2 }
0x1134   :  { %v562_v0 = vadd.f32 %v558_v63, %v131_v62 }
0x1136   :  { %v668_v1 = vmul.f32 -1.442695, %v562_v0 }
0x1138   :  { %728 = vpow2.f32 %v668_v1 }
0x113b   :  { %v560_v2 = vpop.f32.mrf.mxu2 }
0x113e   :  { %v729_v3 = vpop.eup %728 }
0x113f   :  { %v566_v4 = vadd.f32 1.0, %v729_v3 }
0x1141   :  { %730 = vrcp.f32 %v566_v4  ;;  %v578_v8 = vand.u32 2147483648, %v566_v4  ;;  %v576_v10 = vand.u32 2147483647, %v566_v4  ;;  %vm572_vm5 = vweird.f32 %v566_v4 }
0x1143   :  { %v579_v19 = vor.u32 1.1754944e-38, %v578_v8  ;;  %vm577_vm7 = vcmp.eq.f32.partialorder %v576_v10, 8.507059e+37 }
0x1147   :  { %v731_v5 = vpop.eup %730 }
0x1148   :  { %v568_v6 = vmul.f32 %v731_v5, %v566_v4  ;;  %vm573_vm4 = vweird.f32 %v731_v5 }
0x1149   :  { %vm574_vm6 = vmor %vm572_vm5, %vm573_vm4 }
0x114a   :  { %v569_v7 = vsub.f32 1.0, %v568_v6 }
0x114c   :  { %v570_v9 = vmul.f32 %v731_v5, %v569_v7 }
0x114e   :  { %v571_v12 = vadd.f32 %v731_v5, %v570_v9 }
0x1150   :  { %v575_v11 = vsel %vm574_vm6, %v731_v5, %v571_v12 }
0x1151   :  { %v580_v25 = vsel %vm577_vm7, %v579_v19, %v575_v11 }
0x1152   :  { %v582_v13 = vmul.f32 2.0, %v580_v25  ;;  %v584_v20 = vmul.f32 %v580_v25, %v535_v55 }
0x1154   :  { %v669_v14 = vadd.f32 -1.0, %v582_v13 }
0x1156   :  { %586 = vrot.lane.b32.xlu1 %v669_v14, %s766_s3 }
0x11c8   :  { %v587_v15 = vpop.permute.xlu1 %586 }
0x11c9   :  { %v589_v18 = vmul.f32 %v587_v15, %v580_v25 }
0x11cb   :  { %591 = vrot.lane.b32.xlu2 %v589_v18, %s767_s23 }
0x1225   :  { %v592_v21 = vpop.permute.xlu2 %591 }
0x1226   :  { %v594_v22 = vadd.f32 %v592_v21, %v584_v20 }
0x1228   :  { %732 = vtanh.f32 %v594_v22 }
0x122e   :  { %v733_v23 = vpop.eup %732 }
0x122f   :  { %597 = vrot.lane.b32.xlu0 %v733_v23, %s766_s3 }
0x12a1   :  { %v598_v24 = vpop.permute.xlu0 %597 }
0x12a2   :  { %v600_v26 = vmul.f32 %v598_v24, %v580_v25 }
0x12a4   :  { %v602_v16 = vsel %vm601_vm8, %v600_v26, -inf }
0x12a5   :  { %603 = vmax.xlane.f32.xlu1 %v602_v16 }
0x1318   :  { %v604_v17 = vpop.xlane.xlu1 %603 }
0x1319   :  { %v605_v27 = vsub.f32 %v600_v26, %v604_v17 }
0x131b   :  { %v606_v28 = vmul.f32 1.442695, %v605_v27 }
0x131d   :  { %734 = vpow2.f32 %v606_v28 }
0x1323   :  { %v735_v29 = vpop.eup %734 }
0x1324   :  { %609 = vrot.lane.b32.xlu2 %v735_v29, %s767_s23 }
0x137e   :  { %v610_v30 = vpop.permute.xlu2 %609 }
0x137f   :  { %v612_v31 = vsel %vm132_vm9, %v610_v30, 0.0 }
0x1380   :  { %613 = vadd.xlane.f32.xlu0 %v612_v31 }
0x13f3   :  { %v614_v32 = vpop.xlane.xlu0 %613 }
0x13f4   :  { %736 = vrcp.f32 %v614_v32 }
0x13fa   :  { %v737_v33 = vpop.eup %736 }
0x13fb   :  { %v616_v34 = vmul.f32 %v737_v33, %v735_v29 }
0x13fd   :  { %618 = vrot.lane.b32.xlu2 %v616_v34, %s767_s23 }
0x1457   :  { %v619_v35 = vpop.permute.xlu2 %618 }
0x1458   :  { %621 = vst.msk [vmem:[#allocation2] sm:$0xff] %vm132_vm9, %v619_v35 }
0x1459   :  { %632 = dma.vmem_to_hbm [thread:$0]  %s628_s12, 128, %s630_s15, [#allocation3]  }
0x145a   :  { %762 = dma.done.wait [#allocation3], 128  }
0x145b   :  { %763 = vsyncadd [#allocation3], 4294967168 }
0x145c   :  { %637 = vsyncpa [#allocation3], 1 }

</bundles_post_ra>
